<compile_context>
chip_gen: v5e
topology: v5e:2x2
jax: 0.10.0
libtpu: 0.0.40
codegen_flags: <defaults>
</compile_context>

<pallas_src>
import jax
import jax.numpy as jnp
from jax import lax
from jax.experimental import pallas as pl
from jax.experimental.pallas import tpu as pltpu


def _round_up(x: int, m: int) -> int:
    return ((x + m - 1) // m) * m


def _tpu_vmem_budget_and_cores():
    """Generation-aware VMEM tiling budget (bytes) and TensorCores per chip."""
    kind = ""
    try:
        kind = jax.devices()[0].device_kind.lower()
    except Exception:
        pass
    if "v7" in kind:
        return 52 * 1024 * 1024, 2      # 64 MiB physical VMEM, 2 TCs/chip
    if "v5" in kind or "v6" in kind:
        return 100 * 1024 * 1024, 1     # 128 MiB physical VMEM, 1 TC/chip
    return 48 * 1024 * 1024, 1          # unknown generation: conservative, fits all


def clip_wrapper_kernel(x_ref, w_ref, b_ref, t_ref, out_ref, acc_ref):
    # x_ref:   [tb, tk] f32   flattened image tile (cast to bf16 in-kernel)
    # w_ref:   [tk, D]  bf16  encoder weight tile
    # b_ref:   [1, D]   f32   encoder bias row
    # t_ref:   [1, D]   f32   text features, pre-scaled by 1 / max(||t||, 1e-8)
    # out_ref: [tb, 1]  f32   cosine similarities
    # acc_ref: [tb, D]  f32   feature accumulator, persists across the K grid axis
    k = pl.program_id(1)

    @pl.when(k == 0)
    def _init():
        acc_ref[...] = jnp.zeros_like(acc_ref)

    # encode_image: feats += X_tile @ W_tile  (bf16 operands, f32 MXU accumulation)
    x_bf = x_ref[...].astype(jnp.bfloat16)
    acc_ref[...] += jnp.dot(x_bf, w_ref[...], preferred_element_type=jnp.float32)

    @pl.when(k == pl.num_programs(1) - 1)
    def _epilogue():
        # All reduction math in f32 (v5e has no bf16 VPU/EUP; eps needs f32).
        feats = acc_ref[...] + b_ref[...]                          # [tb, D]
        t = t_ref[...]                                             # [1, D] (pre-scaled)
        num = jnp.sum(feats * t, axis=1, keepdims=True)            # [tb, 1]
        sq = jnp.sum(feats * feats, axis=1, keepdims=True)         # [tb, 1]
        eps = jnp.float32(1e-8)
        # rsqrt(max(sq, eps^2)) == 1 / max(||feats||, eps)  (EUP slot, cheap)
        out_ref[...] = num * lax.rsqrt(jnp.maximum(sq, eps * eps))


def clip_wrapper_forward(images, w_enc, b_enc, text_features):
    """images: [B, C, H, W]; w_enc: [K, D]; b_enc: [D]; text_features: [1, D] -> logits [B]."""
    B, C, H, W = images.shape
    K = C * H * W
    D = w_enc.shape[1]

    vmem_budget, num_cores = _tpu_vmem_budget_and_cores()

    # ---- batch tile: as big as possible (the W stream is re-read once per batch tile) ----
    if B >= 512:
        tb = 512
    else:
        tb = min(_round_up(B, 8), 512)
    B_pad = _round_up(B, tb)
    # v7x only: make sure the "parallel" batch axis has work for both TensorCores.
    if num_cores > 1 and (B_pad // tb) == 1 and tb >= 16 and tb % 16 == 0:
        tb //= 2

    # ---- K tile: biggest that fits the generation's VMEM budget ----
    K_al = _round_up(K, 128)
    reserve = 4 * 1024 * 1024                       # compiler / pipeline headroom
    fixed = tb * D * 4 + 4 * D * 4                  # f32 accumulator + bias/text rows
    per_tk = 2 * (D * 2) + 2 * (tb * 4)             # 2x bf16 W bufs + 2x f32 X bufs
    tk_max = max((vmem_budget - reserve - fixed) // per_tk, 128)
    tk = max(min(K_al, 8192, (tk_max // 128) * 128), 128)
    K_pad = _round_up(K_al, tk)

    # ---- layout plumbing (no transpose, no X pre-cast; pad only when needed) ----
    x = images.reshape(B, K).astype(jnp.float32)
    if B_pad != B or K_pad != K:
        x = jnp.pad(x, ((0, B_pad - B), (0, K_pad - K)))
    w = w_enc.astype(jnp.bfloat16)                  # re-streamed -> bf16 pre-cast pays off
    if K_pad != K:
        w = jnp.pad(w, ((0, K_pad - K), (0, 0)))
    b_row = b_enc.reshape(1, D).astype(jnp.float32)
    t_row = text_features.reshape(1, D).astype(jnp.float32)
    # Fold the constant 1 / max(||t||, eps) into the tiny D-vector once (torch eps=1e-8).
    t_norm = jnp.sqrt(jnp.sum(t_row * t_row))
    t_scaled = t_row / jnp.maximum(t_norm, jnp.float32(1e-8))

    grid = (B_pad // tb, K_pad // tk)               # (batch tiles, K tiles) — K last

    out = pl.pallas_call(
        clip_wrapper_kernel,
        out_shape=jax.ShapeDtypeStruct((B_pad, 1), jnp.float32),
        grid=grid,
        in_specs=[
            pl.BlockSpec((tb, tk), lambda i, k: (i, k)),    # image tile (f32)
            pl.BlockSpec((tk, D), lambda i, k: (k, 0)),     # weight tile (bf16)
            pl.BlockSpec((1, D), lambda i, k: (0, 0)),      # bias row
            pl.BlockSpec((1, D), lambda i, k: (0, 0)),      # pre-scaled text row
        ],
        out_specs=pl.BlockSpec((tb, 1), lambda i, k: (i, 0)),
        scratch_shapes=[pltpu.VMEM((tb, D), jnp.float32)],  # feature accumulator
        compiler_params=pltpu.CompilerParams(
            dimension_semantics=("parallel", "arbitrary"),  # megacore on v7x
            vmem_limit_bytes=vmem_budget),
    )(x, w, b_row, t_scaled)

    return out[:B, 0]


def _reference(images, w_enc, b_enc, text_features, cast_bf16=False):
    B = images.shape[0]
    x = images.reshape(B, -1).astype(jnp.float32)
    w = w_enc.astype(jnp.float32)
    if cast_bf16:
        x = x.astype(jnp.bfloat16).astype(jnp.float32)
        w = w.astype(jnp.bfloat16).astype(jnp.float32)
    feats = jnp.dot(x, w, precision=jax.lax.Precision.HIGHEST) + b_enc.reshape(1, -1)
    t = text_features.reshape(1, -1).astype(jnp.float32)
    num = jnp.sum(feats * t, axis=1)
    den = (jnp.maximum(jnp.linalg.norm(feats, axis=1), 1e-8)
           * jnp.maximum(jnp.linalg.norm(t, axis=1), 1e-8))
    return num / den


if __name__ == "__main__":
    # Small shapes consistent with the forward: B=2, C=4, H=W=16, embed D=32.
    B, C, H, W, D = 2, 4, 16, 16, 32
    K = C * H * W

    key = jax.random.PRNGKey(0)
    k_img, k_w, k_b, k_t = jax.random.split(key, 4)
    images = jax.random.normal(k_img, (B, C, H, W), dtype=jnp.float32)
    # Deterministic synthetic "clip_model.encode_image" parameters.
    w_enc = jax.random.normal(k_w, (K, D), dtype=jnp.float32) * 0.02
    b_enc = jax.random.normal(k_b, (D,), dtype=jnp.float32) * 0.02
    # Deterministic synthetic text_features (single text embedding, broadcasts over batch).
    text_features = jax.random.normal(k_t, (1, D), dtype=jnp.float32)

    fwd = jax.jit(clip_wrapper_forward)
    logits = jax.block_until_ready(fwd(images, w_enc, b_enc, text_features))
    assert logits.shape == (B,)

    # Tight check vs. a reference using the same bf16-rounded operands (f32 accumulation).
    ref_bf16 = _reference(images, w_enc, b_enc, text_features, cast_bf16=True)
    assert jnp.allclose(logits, ref_bf16, atol=1e-3, rtol=1e-3), (logits, ref_bf16)
    # Loose sanity check vs. the pure-f32 reference (bf16 operands lose mantissa).
    ref_f32 = _reference(images, w_enc, b_enc, text_features)
    assert jnp.allclose(logits, ref_f32, atol=5e-2, rtol=5e-2), (logits, ref_f32)

    print("KERNEL_OK")
</pallas_src>

<mosaic_0001>
module attributes {stable_mosaic.version = 11 : i64} {
  func.func @clip_wrapper_kernel(%arg0: i32, %arg1: i32, %arg2: memref<8x1024xf32, #tpu.memory_space<vmem>>, %arg3: memref<1024x32xbf16, #tpu.memory_space<vmem>>, %arg4: memref<1x32xf32, #tpu.memory_space<vmem>>, %arg5: memref<1x32xf32, #tpu.memory_space<vmem>>, %arg6: memref<8x1xf32, #tpu.memory_space<vmem>>, %arg7: memref<8x32xf32, #tpu.memory_space<vmem>>) attributes {dimension_semantics = [#tpu.dimension_semantics<parallel>, #tpu.dimension_semantics<arbitrary>], iteration_bounds = array<i64: 1, 1>, scalar_prefetch = 0 : i64, scratch_operands = 1 : i64, tpu.core_type = #tpu.core_type<tc>, window_params = [{transform_indices = @transform_0, window_bounds = array<i64: 8, 1024>}, {transform_indices = @transform_1, window_bounds = array<i64: 1024, 32>}, {pipeline_mode = #tpu.pipeline_mode<synchronous>, transform_indices = @transform_2, window_bounds = array<i64: 1, 32>}, {pipeline_mode = #tpu.pipeline_mode<synchronous>, transform_indices = @transform_3, window_bounds = array<i64: 1, 32>}, {transform_indices = @transform_4, window_bounds = array<i64: 8, 1>}]} {
    %c0_i32 = arith.constant 0 : i32
    %0 = arith.cmpi eq, %arg1, %c0_i32 : i32
    %1 = arith.extui %0 : i1 to i32
    %c0_i32_0 = arith.constant 0 : i32
    %2 = arith.cmpi ne, %1, %c0_i32_0 : i32
    scf.if %2 {
      %cst_10 = arith.constant 0.000000e+00 : f32
      %13 = vector.broadcast %cst_10 : f32 to vector<8x32xf32>
      %c0_11 = arith.constant 0 : index
      %c0_12 = arith.constant 0 : index
      %14 = vector.load %arg7[%c0_11, %c0_12] : memref<8x32xf32, #tpu.memory_space<vmem>>, vector<8x32xf32>
      tpu.vector_store %arg7[%c0_11, %c0_12], %13 {strides = array<i32>} : memref<8x32xf32, #tpu.memory_space<vmem>>, vector<8x32xf32>,
    } else {
    }
    %c0 = arith.constant 0 : index
    %c0_1 = arith.constant 0 : index
    %3 = vector.load %arg2[%c0, %c0_1] : memref<8x1024xf32, #tpu.memory_space<vmem>>, vector<8x1024xf32>
    %4 = arith.truncf %3 : vector<8x1024xf32> to vector<8x1024xbf16>
    %c0_2 = arith.constant 0 : index
    %c0_3 = arith.constant 0 : index
    %5 = vector.load %arg7[%c0_2, %c0_3] : memref<8x32xf32, #tpu.memory_space<vmem>>, vector<8x32xf32>
    %c0_4 = arith.constant 0 : index
    %c0_5 = arith.constant 0 : index
    %6 = vector.load %arg3[%c0_4, %c0_5] : memref<1024x32xbf16, #tpu.memory_space<vmem>>, vector<1024x32xbf16>
    %cst = arith.constant dense<0.000000e+00> : vector<8x32xf32>
    %7 = tpu.matmul %4, %6, %cst {dimension_numbers = #tpu.dot_dimension_numbers<[1], [0], [0], [1], [0, 0, 1, 1], [], []>} : vector<8x1024xbf16>, vector<1024x32xbf16>, vector<8x32xf32> -> vector<8x32xf32>
    %8 = arith.addf %5, %7 : vector<8x32xf32>
    %c0_6 = arith.constant 0 : index
    %c0_7 = arith.constant 0 : index
    %9 = vector.load %arg7[%c0_6, %c0_7] : memref<8x32xf32, #tpu.memory_space<vmem>>, vector<8x32xf32>
    tpu.vector_store %arg7[%c0_6, %c0_7], %8 {strides = array<i32>} : memref<8x32xf32, #tpu.memory_space<vmem>>, vector<8x32xf32>,
    %c0_i32_8 = arith.constant 0 : i32
    %10 = arith.cmpi eq, %arg1, %c0_i32_8 : i32
    %11 = arith.extui %10 : i1 to i32
    %c0_i32_9 = arith.constant 0 : i32
    %12 = arith.cmpi ne, %11, %c0_i32_9 : i32
    scf.if %12 {
      %c0_10 = arith.constant 0 : index
      %c0_11 = arith.constant 0 : index
      %13 = vector.load %arg7[%c0_10, %c0_11] : memref<8x32xf32, #tpu.memory_space<vmem>>, vector<8x32xf32>
      %c0_12 = arith.constant 0 : index
      %c0_13 = arith.constant 0 : index
      %14 = vector.load %arg4[%c0_12, %c0_13] : memref<1x32xf32, #tpu.memory_space<vmem>>, vector<1x32xf32>
      %15 = vector.broadcast %14 : vector<1x32xf32> to vector<8x32xf32>
      %16 = arith.addf %13, %15 : vector<8x32xf32>
      %c0_14 = arith.constant 0 : index
      %c0_15 = arith.constant 0 : index
      %17 = vector.load %arg5[%c0_14, %c0_15] : memref<1x32xf32, #tpu.memory_space<vmem>>, vector<1x32xf32>
      %18 = vector.broadcast %17 : vector<1x32xf32> to vector<8x32xf32>
      %19 = arith.mulf %16, %18 : vector<8x32xf32>
      %cst_16 = arith.constant dense<0.000000e+00> : vector<8xf32>
      %20 = vector.multi_reduction <add>, %19, %cst_16 [1] : vector<8x32xf32> to vector<8xf32>
      %21 = vector.shape_cast %20 : vector<8xf32> to vector<8x1xf32>
      %22 = arith.mulf %16, %16 : vector<8x32xf32>
      %cst_17 = arith.constant dense<0.000000e+00> : vector<8xf32>
      %23 = vector.multi_reduction <add>, %22, %cst_17 [1] : vector<8x32xf32> to vector<8xf32>
      %24 = vector.shape_cast %23 : vector<8xf32> to vector<8x1xf32>
      %cst_18 = arith.constant 9.99999993E-9 : f32
      %cst_19 = arith.constant 9.99999993E-9 : f32
      %25 = arith.mulf %cst_18, %cst_19 : f32
      %26 = vector.broadcast %25 : f32 to vector<8x1xf32>
      %27 = arith.maximumf %24, %26 : vector<8x1xf32>
      %28 = math.rsqrt %27 : vector<8x1xf32>
      %29 = arith.mulf %21, %28 : vector<8x1xf32>
      %c0_20 = arith.constant 0 : index
      %c0_21 = arith.constant 0 : index
      %30 = vector.load %arg6[%c0_20, %c0_21] : memref<8x1xf32, #tpu.memory_space<vmem>>, vector<8x1xf32>
      tpu.vector_store %arg6[%c0_20, %c0_21], %29 {strides = array<i32>} : memref<8x1xf32, #tpu.memory_space<vmem>>, vector<8x1xf32>,
    } else {
    }
    return
  }
  func.func @transform_0(%arg0: i32, %arg1: i32) -> (i32, i32) {
    %c0_i32 = arith.constant 0 : i32
    return %arg0, %arg1 : i32, i32
  }
  func.func @transform_1(%arg0: i32, %arg1: i32) -> (i32, i32) {
    %c0_i32 = arith.constant 0 : i32
    %c0_i32_0 = arith.constant 0 : i32
    return %arg1, %c0_i32 : i32, i32
  }
  func.func @transform_2(%arg0: i32, %arg1: i32) -> (i32, i32) {
    %c0_i32 = arith.constant 0 : i32
    %c0_i32_0 = arith.constant 0 : i32
    %c0_i32_1 = arith.constant 0 : i32
    return %c0_i32, %c0_i32_0 : i32, i32
  }
  func.func @transform_3(%arg0: i32, %arg1: i32) -> (i32, i32) {
    %c0_i32 = arith.constant 0 : i32
    %c0_i32_0 = arith.constant 0 : i32
    %c0_i32_1 = arith.constant 0 : i32
    return %c0_i32, %c0_i32_0 : i32, i32
  }
  func.func @transform_4(%arg0: i32, %arg1: i32) -> (i32, i32) {
    %c0_i32 = arith.constant 0 : i32
    %c0_i32_0 = arith.constant 0 : i32
    return %arg0, %c0_i32 : i32, i32
  }
}

</mosaic_0001>

<bundles_post_ra>
// kernel: clip_wrapper_forward.1
= control target key start
LH: loop header
LB: loop body
LE: loop exit
PB: predicated region body
PF: predicated region fallthrough
CT: control target
= control target key end

     0   :  { %vm21_vm0 = vcmask 261120   ;;  %vm692_vm4 = vcmask 7168   ;;  %s1278_s1 = inlined_call_operand.vmem [shape: bf16[1024,32], index: 1, kind: input, shape index: {}]   ;;  %s1279_s0 = inlined_call_operand.vmem [shape: f32[8,1024], index: 0, kind: input, shape index: {}]   ;;  %s1280_s2 = inlined_call_operand.vmem [shape: f32[1,32], index: 2, kind: input, shape index: {}]   ;;  %s1281_s3 = inlined_call_operand.vmem [shape: f32[1,32], index: 3, kind: input, shape index: {}]   ;;  %s1282_s4 = inlined_call_operand.vmem [shape: f32[8,1], index: 4, kind: output, shape index: {}]  }
   0x1   :  { %v961_v0 = vld [vmem:[%s1278_s1 + $0x38] sm:$0xff]  ;;  %v960_v4 = vld [vmem:[%s1278_s1 + $0x30] sm:$0xff]  ;;  %v959_v8 = vld [vmem:[%s1278_s1 + $0x28] sm:$0xff] }
   0x2   :  { %v969_v1 = vld [vmem:[%s1278_s1 + $0x78] sm:$0xff]  ;;  %552 = vmatpush.bf16.msra.mxu0 %v961_v0  ;;  %v968_v5 = vld [vmem:[%s1278_s1 + $0x70] sm:$0xff]  ;;  %v967_v9 = vld [vmem:[%s1278_s1 + $0x68] sm:$0xff] }
   0x3   :  { %v977_v2 = vld [vmem:[%s1278_s1 + $0xb8] sm:$0xff]  ;;  %565 = vmatpush.bf16.msra.mxu1 %v969_v1  ;;  %v976_v6 = vld [vmem:[%s1278_s1 + $0xb0] sm:$0xff]  ;;  %v975_v10 = vld [vmem:[%s1278_s1 + $0xa8] sm:$0xff] }
   0x4   :  { %v985_v3 = vld [vmem:[%s1278_s1 + $0xf8] sm:$0xff]  ;;  %578 = vmatpush.bf16.msra.mxu2 %v977_v2  ;;  %v984_v7 = vld [vmem:[%s1278_s1 + $0xf0] sm:$0xff]  ;;  %v983_v11 = vld [vmem:[%s1278_s1 + $0xe8] sm:$0xff] }
   0x5   :  { %591 = vmatpush.bf16.msra.mxu3 %v985_v3  ;;  %v958_v12 = vld [vmem:[%s1278_s1 + $0x20] sm:$0xff]  ;;  %v957_v16 = vld [vmem:[%s1278_s1 + $0x18] sm:$0xff]  ;;  %v956_v20 = vld [vmem:[%s1278_s1 + $0x10] sm:$0xff] }
   0x6   :  { %553 = vmatpush.bf16.msra.mxu0 %v960_v4  ;;  %v966_v13 = vld [vmem:[%s1278_s1 + $0x60] sm:$0xff]  ;;  %v965_v17 = vld [vmem:[%s1278_s1 + $0x58] sm:$0xff]  ;;  %v964_v21 = vld [vmem:[%s1278_s1 + $0x50] sm:$0xff] }
   0x7   :  { %566 = vmatpush.bf16.msra.mxu1 %v968_v5  ;;  %v974_v14 = vld [vmem:[%s1278_s1 + $0xa0] sm:$0xff]  ;;  %v973_v18 = vld [vmem:[%s1278_s1 + $0x98] sm:$0xff]  ;;  %v972_v22 = vld [vmem:[%s1278_s1 + $0x90] sm:$0xff] }
   0x8   :  { %579 = vmatpush.bf16.msra.mxu2 %v976_v6  ;;  %v982_v15 = vld [vmem:[%s1278_s1 + $0xe0] sm:$0xff]  ;;  %v981_v19 = vld [vmem:[%s1278_s1 + $0xd8] sm:$0xff]  ;;  %v980_v23 = vld [vmem:[%s1278_s1 + $0xd0] sm:$0xff] }
   0x9   :  { %592 = vmatpush.bf16.msra.mxu3 %v984_v7  ;;  %v955_v24 = vld [vmem:[%s1278_s1 + $0x8] sm:$0xff]  ;;  %v954_v28 = vld [vmem:[%s1278_s1] sm:$0xff]  ;;  %v993_v32 = vld [vmem:[%s1278_s1 + $0x138] sm:$0xff] }
   0xa   :  { %554 = vmatpush.bf16.msra.mxu0 %v959_v8  ;;  %v963_v25 = vld [vmem:[%s1278_s1 + $0x48] sm:$0xff]  ;;  %v962_v29 = vld [vmem:[%s1278_s1 + $0x40] sm:$0xff]  ;;  %v25_v33 = vld [vmem:[%s1279_s0 + $0x10] sm:$0xff] }
   0xb   :  { %567 = vmatpush.bf16.msra.mxu1 %v967_v9  ;;  %v971_v26 = vld [vmem:[%s1278_s1 + $0x88] sm:$0xff]  ;;  %v970_v30 = vld [vmem:[%s1278_s1 + $0x80] sm:$0xff]  ;;  %v1001_v35 = vld [vmem:[%s1278_s1 + $0x178] sm:$0xff]  ;;  %v33_v40 = vpack.c.bf16 %v25_v33, %v25_v33 }
   0xc   :  { %580 = vmatpush.bf16.msra.mxu2 %v975_v10  ;;  %v979_v27 = vld [vmem:[%s1278_s1 + $0xc8] sm:$0xff]  ;;  %v978_v31 = vld [vmem:[%s1278_s1 + $0xc0] sm:$0xff]  ;;  %v26_v36 = vld [vmem:[%s1279_s0 + $0x18] sm:$0xff] }
   0xd   :  { %593 = vmatpush.bf16.msra.mxu3 %v983_v11  ;;  %v23_v34 = vld [vmem:[%s1279_s0] sm:$0xff]  ;;  %v24_v37 = vld [vmem:[%s1279_s0 + $0x8] sm:$0xff]  ;;  %v1009_v38 = vld [vmem:[%s1278_s1 + $0x1b8] sm:$0xff]  ;;  %v34_v42 = vpack.c.bf16 %v26_v36, %v26_v36 }
   0xe   :  { %555 = vmatpush.bf16.msra.mxu0 %v958_v12  ;;  %v1017_v39 = vld [vmem:[%s1278_s1 + $0x1f8] sm:$0xff]  ;;  %v31_v41 = vpack.c.bf16 %v23_v34, %v23_v34  ;;  %v32_v43 = vpack.c.bf16 %v24_v37, %v24_v37  ;;  %v992_v44 = vld [vmem:[%s1278_s1 + $0x130] sm:$0xff]  ;;  %v991_v48 = vld [vmem:[%s1278_s1 + $0x128] sm:$0xff] }
   0xf   :  { %568 = vmatpush.bf16.msra.mxu1 %v966_v13  ;;  %v1000_v45 = vld [vmem:[%s1278_s1 + $0x170] sm:$0xff]  ;;  %v999_v49 = vld [vmem:[%s1278_s1 + $0x168] sm:$0xff]  ;;  %v990_v52 = vld [vmem:[%s1278_s1 + $0x120] sm:$0xff] }
  0x10   :  { %581 = vmatpush.bf16.msra.mxu2 %v974_v14  ;;  %v1008_v46 = vld [vmem:[%s1278_s1 + $0x1b0] sm:$0xff]  ;;  %v1007_v50 = vld [vmem:[%s1278_s1 + $0x1a8] sm:$0xff]  ;;  %v998_v53 = vld [vmem:[%s1278_s1 + $0x160] sm:$0xff] }
  0x11   :  { %594 = vmatpush.bf16.msra.mxu3 %v982_v15  ;;  %v1016_v47 = vld [vmem:[%s1278_s1 + $0x1f0] sm:$0xff]  ;;  %v1015_v51 = vld [vmem:[%s1278_s1 + $0x1e8] sm:$0xff]  ;;  %v1006_v54 = vld [vmem:[%s1278_s1 + $0x1a0] sm:$0xff] }
  0x12   :  { %556 = vmatpush.bf16.msra.mxu0 %v957_v16  ;;  %v1014_v55 = vld [vmem:[%s1278_s1 + $0x1e0] sm:$0xff]  ;;  %v989_v56 = vld [vmem:[%s1278_s1 + $0x118] sm:$0xff]  ;;  %v988_v60 = vld [vmem:[%s1278_s1 + $0x110] sm:$0xff] }
  0x13   :  { %569 = vmatpush.bf16.msra.mxu1 %v965_v17  ;;  %v997_v57 = vld [vmem:[%s1278_s1 + $0x158] sm:$0xff]  ;;  %v996_v61 = vld [vmem:[%s1278_s1 + $0x150] sm:$0xff]  ;;  %v987_v0 = vld [vmem:[%s1278_s1 + $0x108] sm:$0xff] }
  0x14   :  { %582 = vmatpush.bf16.msra.mxu2 %v973_v18  ;;  %v1005_v58 = vld [vmem:[%s1278_s1 + $0x198] sm:$0xff]  ;;  %v1004_v62 = vld [vmem:[%s1278_s1 + $0x190] sm:$0xff]  ;;  %v995_v1 = vld [vmem:[%s1278_s1 + $0x148] sm:$0xff]  ;;  %v1023_v18 = vmov 0.0  }
  0x15   :  { %595 = vmatpush.bf16.msra.mxu3 %v981_v19  ;;  %v1013_v59 = vld [vmem:[%s1278_s1 + $0x1d8] sm:$0xff]  ;;  %v1012_v63 = vld [vmem:[%s1278_s1 + $0x1d0] sm:$0xff]  ;;  %v1003_v2 = vld [vmem:[%s1278_s1 + $0x188] sm:$0xff]  ;;  %22 = vst.msk [vmem:[#allocation2] sm:$0xff] %vm21_vm0, %v1023_v18 }
  0x16   :  { %557 = vmatpush.bf16.msra.mxu0 %v956_v20  ;;  %v1011_v3 = vld [vmem:[%s1278_s1 + $0x1c8] sm:$0xff]  ;;  %v986_v4 = vld [vmem:[%s1278_s1 + $0x100] sm:$0xff]  ;;  %v29_v10 = vld [vmem:[%s1279_s0 + $0x30] sm:$0xff] }
  0x17   :  { %570 = vmatpush.bf16.msra.mxu1 %v964_v21  ;;  %v994_v5 = vld [vmem:[%s1278_s1 + $0x140] sm:$0xff]  ;;  %v28_v8 = vld [vmem:[%s1279_s0 + $0x28] sm:$0xff]  ;;  %v30_v11 = vld [vmem:[%s1279_s0 + $0x38] sm:$0xff]  ;;  %v37_v14 = vpack.c.bf16 %v29_v10, %v29_v10 }
  0x18   :  { %583 = vmatpush.bf16.msra.mxu2 %v972_v22  ;;  %v1002_v6 = vld [vmem:[%s1278_s1 + $0x180] sm:$0xff]  ;;  %v36_v13 = vpack.c.bf16 %v28_v8, %v28_v8  ;;  %v38_v15 = vpack.c.bf16 %v30_v11, %v30_v11 }
  0x19   :  { %596 = vmatpush.bf16.msra.mxu3 %v980_v23  ;;  %v27_v7 = vld [vmem:[%s1279_s0 + $0x20] sm:$0xff] }
  0x1a   :  { %558 = vmatpush.bf16.msra.mxu0 %v955_v24  ;;  %v1010_v9 = vld [vmem:[%s1278_s1 + $0x1c0] sm:$0xff]  ;;  %v35_v12 = vpack.c.bf16 %v27_v7, %v27_v7 }
  0x1b   :  { %571 = vmatpush.bf16.msra.mxu1 %v963_v25 }
  0x1c   :  { %584 = vmatpush.bf16.msra.mxu2 %v971_v26  ;;  %v39_v37 = vld [vmem:[#allocation2] sm:$0xff] }
  0x1d   :  { %597 = vmatpush.bf16.msra.mxu3 %v979_v27 }
  0x1e   :  { %559 = vmatpush.bf16.msra.mxu0 %v954_v28 }
  0x1f   :  { %572 = vmatpush.bf16.msra.mxu1 %v962_v29 }
  0x20   :  { %585 = vmatpush.bf16.msra.mxu2 %v970_v30 }
  0x21   :  { %598 = vmatpush.bf16.msra.mxu3 %v978_v31  ;;  %560 = vmatmul.bf16.vlgmr.msra.gmra.mxu0 %v31_v41 }
  0x22   :  { %604 = vmatpush.bf16.msrb.mxu0 %v993_v32  ;;  %573 = vmatmul.bf16.vlgmr.msra.gmra.mxu1 %v32_v43 }
  0x23   :  { %617 = vmatpush.bf16.msrb.mxu1 %v1001_v35  ;;  %586 = vmatmul.bf16.vlgmr.msra.gmra.mxu2 %v33_v40 }
  0x24   :  { %630 = vmatpush.bf16.msrb.mxu2 %v1009_v38  ;;  %599 = vmatmul.bf16.vlgmr.msra.gmra.mxu3 %v34_v42  ;;  %v1019_v42 = vld [vmem:[%s1280_s2] ss:$0 sm:$0xff] }
  0x25   :  { %643 = vmatpush.bf16.msrb.mxu3 %v1017_v39 }
  0x26   :  { %605 = vmatpush.bf16.msrb.mxu0 %v992_v44 }
  0x27   :  { %618 = vmatpush.bf16.msrb.mxu1 %v1000_v45 }
  0x28   :  { %631 = vmatpush.bf16.msrb.mxu2 %v1008_v46 }
  0x29   :  { %644 = vmatpush.bf16.msrb.mxu3 %v1016_v47  ;;  %v1020_v47 = vld [vmem:[%s1281_s3] ss:$0 sm:$0xff] }
  0x2a   :  { %606 = vmatpush.bf16.msrb.mxu0 %v991_v48 }
  0x2b   :  { %619 = vmatpush.bf16.msrb.mxu1 %v999_v49 }
  0x2c   :  { %632 = vmatpush.bf16.msrb.mxu2 %v1007_v50 }
  0x2d   :  { %645 = vmatpush.bf16.msrb.mxu3 %v1015_v51 }
  0x2e   :  { %607 = vmatpush.bf16.msrb.mxu0 %v990_v52 }
  0x2f   :  { %620 = vmatpush.bf16.msrb.mxu1 %v998_v53 }
  0x30   :  { %633 = vmatpush.bf16.msrb.mxu2 %v1006_v54 }
  0x31   :  { %646 = vmatpush.bf16.msrb.mxu3 %v1014_v55 }
  0x32   :  { %608 = vmatpush.bf16.msrb.mxu0 %v989_v56 }
  0x33   :  { %621 = vmatpush.bf16.msrb.mxu1 %v997_v57 }
  0x34   :  { %634 = vmatpush.bf16.msrb.mxu2 %v1005_v58 }
  0x35   :  { %647 = vmatpush.bf16.msrb.mxu3 %v1013_v59 }
  0x36   :  { %609 = vmatpush.bf16.msrb.mxu0 %v988_v60 }
  0x37   :  { %622 = vmatpush.bf16.msrb.mxu1 %v996_v61 }
  0x38   :  { %635 = vmatpush.bf16.msrb.mxu2 %v1004_v62 }
  0x39   :  { %648 = vmatpush.bf16.msrb.mxu3 %v1012_v63 }
  0x3a   :  { %610 = vmatpush.bf16.msrb.mxu0 %v987_v0 }
  0x3b   :  { %623 = vmatpush.bf16.msrb.mxu1 %v995_v1 }
  0x3c   :  { %636 = vmatpush.bf16.msrb.mxu2 %v1003_v2 }
  0x3d   :  { %649 = vmatpush.bf16.msrb.mxu3 %v1011_v3 }
  0x3e   :  { %611 = vmatpush.bf16.msrb.mxu0 %v986_v4 }
  0x3f   :  { %624 = vmatpush.bf16.msrb.mxu1 %v994_v5 }
  0x40   :  { %637 = vmatpush.bf16.msrb.mxu2 %v1002_v6 }
  0x41   :  { %650 = vmatpush.bf16.msrb.mxu3 %v1010_v9  ;;  %612 = vmatmul.bf16.vlgmr.msrb.gmra.mxu0 %v35_v12 }
  0x42   :  { %625 = vmatmul.bf16.vlgmr.msrb.gmra.mxu1 %v36_v13 }
  0x43   :  { %638 = vmatmul.bf16.vlgmr.msrb.gmra.mxu2 %v37_v14 }
  0x44   :  { %651 = vmatmul.bf16.vlgmr.msrb.gmra.mxu3 %v38_v15 }
  0x9e   :  { %v561_v16 = vpop.f32.mrf.mxu0 }
  0x9f   :  { %v574_v17 = vpop.f32.mrf.mxu1 }
  0xa0   :  { %v575_v25 = vadd.f32 %v574_v17, %v561_v16 }
  0xa6   :  { %v587_v19 = vpop.f32.mrf.mxu2  ;;  %v563_v21 = vpop.f32.mrf.mxu0 }
  0xa7   :  { %v600_v20 = vpop.f32.mrf.mxu3  ;;  %v576_v22 = vpop.f32.mrf.mxu1  ;;  %v588_v26 = vadd.f32 %v587_v19, %v575_v25 }
  0xa9   :  { %v601_v27 = vadd.f32 %v600_v20, %v588_v26 }
  0xae   :  { %v589_v23 = vpop.f32.mrf.mxu2 }
  0xaf   :  { %v602_v24 = vpop.f32.mrf.mxu3 }
  0xbe   :  { %v613_v28 = vpop.f32.mrf.mxu0 }
  0xbf   :  { %v626_v29 = vpop.f32.mrf.mxu1  ;;  %v614_v30 = vadd.f32 %v613_v28, %v601_v27 }
  0xc1   :  { %v627_v31 = vadd.f32 %v626_v29, %v614_v30 }
  0xc6   :  { %v639_v32 = vpop.f32.mrf.mxu2  ;;  %v615_v35 = vpop.f32.mrf.mxu0 }
  0xc7   :  { %v652_v33 = vpop.f32.mrf.mxu3  ;;  %v640_v34 = vadd.f32 %v639_v32, %v627_v31  ;;  %v628_v36 = vpop.f32.mrf.mxu1 }
  0xc9   :  { %v653_v38 = vadd.f32 %v652_v33, %v640_v34 }
  0xcb   :  { %v656_v39 = vadd.f32 %v653_v38, %v39_v37 }
  0xcd   :  { %658 = vst.msk [vmem:[#allocation2] sm:$0xff] %vm21_vm0, %v656_v39 }
  0xce   :  { %v641_v40 = vpop.f32.mrf.mxu2 }
  0xcf   :  { %v654_v41 = vpop.f32.mrf.mxu3 }
  0xd4   :  { %v662_v43 = vld [vmem:[#allocation2] sm:$0xff] }
  0xd5   :  { %v667_v44 = vadd.f32 %v1019_v42, %v662_v43 }
  0xd7   :  { %v676_v45 = vmul.f32 %v667_v44, %v667_v44  ;;  %v672_v48 = vmul.f32 %v1020_v47, %v667_v44 }
  0xd9   :  { %v677_v46 = vsel %vm21_vm0, %v676_v45, 0.0  ;;  %v673_v49 = vsel %vm21_vm0, %v672_v48, 0.0 }
  0xda   :  { %678 = vadd.xlane.f32.xlu0 %v677_v46 }
  0xe2   :  { %674 = vadd.xlane.f32.xlu0 %v673_v49 }
 0x14d   :  { %v679_v50 = vpop.xlane.xlu0 %678 }
 0x14e   :  { %v680_v51 = vmax.f32 %v679_v50, 1e-16 }
 0x150   :  { %1021 = vrsqrt.f32 %v680_v51  ;;  %vm687_vm2 = vweird.f32 %v680_v51 }
 0x155   :  { %v675_v59 = vpop.xlane.xlu0 %674 }
 0x156   :  { %v1022_v52 = vpop.eup %1021 }
 0x157   :  { %v682_v53 = vmul.f32 %v1022_v52, %v680_v51  ;;  %vm688_vm1 = vweird.f32 %v1022_v52 }
 0x158   :  { %vm689_vm3 = vmor %vm687_vm2, %vm688_vm1 }
 0x159   :  { %v683_v54 = vmul.f32 %v1022_v52, %v682_v53 }
 0x15b   :  { %v684_v55 = vmul.f32 0.5, %v683_v54 }
 0x15d   :  { %v685_v56 = vsub.f32 1.5, %v684_v55 }
 0x15f   :  { %v686_v57 = vmul.f32 %v1022_v52, %v685_v56 }
 0x161   :  { %v690_v58 = vsel %vm689_vm3, %v1022_v52, %v686_v57 }
 0x162   :  { %v691_v60 = vmul.f32 %v690_v58, %v675_v59 }
 0x164   :  { %693 = vst.msk [vmem:[%s1282_s4] sm:$0xff] %vm692_vm4, %v691_v60 }

</bundles_post_ra>
